<compile_context>
chip_gen: v5e
topology: v5e:2x2
jax: 0.10.0
libtpu: 0.0.40
codegen_flags: <defaults>
</compile_context>

<pallas_src>
import functools

import jax
import jax.numpy as jnp
from jax import lax
from jax.experimental import pallas as pl
from jax.experimental.pallas import tpu as pltpu


def _decoder_embeddings_kernel(
    ids_ref,        # SMEM (B*S,) int32 -- scalar-prefetched token ids
    wtab_ref,       # word-embedding table: VMEM (V, Hp) block (small vocab) or HBM ref
    pos_ref,        # VMEM (tile_t, Hp) -- position rows for this tile (reused over batch)
    gamma_ref,      # VMEM (1, Hp)
    beta_ref,       # VMEM (1, Hp)
    out_ref,        # VMEM (tile_t, Hp)
    gather_buf,     # VMEM (2, tile_t, Hp) scratch -- double-buffered gathered rows
    gather_sems,    # DMA semaphores (2,), one per gather buffer
    *, tile_t, seq_len, h_real, eps, unroll,
):
    t = pl.program_id(0)            # tile index within a sequence (outer, parallel)
    b = pl.program_id(1)            # batch index (inner, arbitrary)
    nb = pl.num_programs(1)
    base = b * seq_len + t * tile_t  # first flattened token of tile (t, b)
    buf = b % 2

    def issue(first_token, dst_buf):
        # Start all tile_t row-gather DMAs for one tile (no waits interleaved, so
        # every row copy is in flight at once).  Contract (nn.Embedding): ids in [0, V).
        def body(j, carry):
            row = ids_ref[first_token + j]
            pltpu.make_async_copy(
                wtab_ref.at[pl.ds(row, 1), :],
                gather_buf.at[dst_buf, pl.ds(j, 1), :],
                gather_sems.at[dst_buf],
            ).start()
            return carry
        lax.fori_loop(0, tile_t, body, None, unroll=unroll)

    def wait_all(dst_buf):
        # One wait per issued row copy; the descriptor only conveys the wait size
        # (and the gather_buf dependence), it never touches SMEM ids.
        def body(j, carry):
            pltpu.make_async_copy(
                gather_buf.at[dst_buf, pl.ds(0, 1), :],
                gather_buf.at[dst_buf, pl.ds(0, 1), :],
                gather_sems.at[dst_buf],
            ).wait()
            return carry
        lax.fori_loop(0, tile_t, body, None, unroll=unroll)

    # Prime the pipeline at the start of each inner (batch) loop.  Priming on
    # b == 0 (not on the global step) keeps the cross-step chain correct even if
    # the outer "parallel" axis is split across TensorCores on v7x.
    @pl.when(b == 0)
    def _():
        issue(base, 0)

    # Prefetch the next batch element's rows (same tile) before blocking, so the
    # gather for (t, b+1) overlaps this step's waits + LayerNorm compute.
    @pl.when(b + 1 < nb)
    def _():
        issue(base + seq_len, 1 - buf)

    wait_all(buf)                    # rows for (t, b) are now in gather_buf[buf]
    gathered = gather_buf[buf]

    # word-emb + pos-emb; LayerNorm stats in f32 even for bf16 tables.
    emb = gathered.astype(jnp.float32) + pos_ref[...].astype(jnp.float32)

    h_pad = emb.shape[-1]
    inv_h = 1.0 / h_real
    mean = jnp.sum(emb, axis=-1, keepdims=True) * inv_h   # pad lanes are zero
    centered = emb - mean
    sq = centered * centered
    if h_pad != h_real:
        # Mask padded lanes out of the variance; gamma/beta zero-padding then
        # zeroes the padded output lanes, so real lanes match unpadded LayerNorm.
        lane = lax.broadcasted_iota(jnp.int32, emb.shape, 1)
        sq = jnp.where(lane < h_real, sq, 0.0)
    var = jnp.sum(sq, axis=-1, keepdims=True) * inv_h
    normed = centered * lax.rsqrt(var + eps)
    out_ref[...] = (normed * gamma_ref[...].astype(jnp.float32)
                    + beta_ref[...].astype(jnp.float32)).astype(out_ref.dtype)


def decoder_embeddings(ids, word_table, pos_table, gamma, beta, *,
                       eps=1e-5, tile_t=None, out_dtype=None,
                       vmem_table_bytes_max=2 * 1024 * 1024,
                       force_hbm_gather=False):
    B, S = ids.shape
    V, H = word_table.shape
    P = pos_table.shape[0]
    if S > P:
        raise ValueError(f"seq length {S} exceeds max_position_embeddings {P}")
    if S % 8 != 0:
        # TODO(synk): support S not divisible by 8 (needs a padded/masked tail tile).
        raise ValueError(f"seq length {S} must be divisible by 8 for this kernel")

    out_dtype = word_table.dtype if out_dtype is None else jnp.dtype(out_dtype)
    tb = jnp.dtype(word_table.dtype).itemsize
    ob = jnp.dtype(out_dtype).itemsize

    # Pad hidden dim to a multiple of 128 lanes -> lane-dense, unmasked stores.
    Hp = ((H + 127) // 128) * 128
    if Hp != H:
        word_table = jnp.pad(word_table, ((0, 0), (0, Hp - H)))
        pos_table = jnp.pad(pos_table, ((0, 0), (0, Hp - H)))
        gamma = jnp.pad(gamma.reshape(-1), (0, Hp - H))
        beta = jnp.pad(beta.reshape(-1), (0, Hp - H))

    # VMEM-budgeted tile size: largest multiple-of-8 divisor of S whose live set
    # (pos + out double buffers, gather double buffer, f32 temporaries) fits a
    # conservative budget valid for v5e/v6e/v7x (v7x has only 64 MiB physical VMEM).
    # TODO(synk): when S is tiny, span multiple sequences per tile to amortize the
    # ~0.35 us/step grid overhead.
    if tile_t is None:
        budget = 20 * 2**20
        per_row = Hp * (2 * tb + 2 * ob + 2 * tb + 4 * 4)
        cands = [c for c in (1024, 512, 256, 128, 64, 32, 16, 8)
                 if S % c == 0 and c * per_row <= budget]
        tile_t = cands[0] if cands else 8
    assert S % tile_t == 0 and tile_t % 8 == 0

    tiles_per_seq = S // tile_t
    T = B * S
    # TODO(synk): for very large B*S, stream ids from HBM per tile instead of
    # prefetching the whole id vector into SMEM.
    flat_ids = ids.reshape(T).astype(jnp.int32)

    # Small-vocab fast path: hold the whole table VMEM-resident (fetched from HBM
    # exactly once by BlockSpec); row gathers then become local VMEM->VMEM copies.
    table_in_vmem = (not force_hbm_gather) and (V * Hp * tb <= vmem_table_bytes_max)
    if table_in_vmem:
        wtab_spec = pl.BlockSpec((V, Hp), lambda t, b, ids: (0, 0))
    else:
        wtab_spec = pl.BlockSpec(memory_space=pl.ANY)   # table stays in HBM

    grid_spec = pltpu.PrefetchScalarGridSpec(
        num_scalar_prefetch=1,
        grid=(tiles_per_seq, B),   # inner axis = batch -> pos block re-fetch skipped
        in_specs=[
            wtab_spec,
            pl.BlockSpec((tile_t, Hp), lambda t, b, ids: (t, 0)),   # pos rows
            pl.BlockSpec((1, Hp), lambda t, b, ids: (0, 0)),        # gamma
            pl.BlockSpec((1, Hp), lambda t, b, ids: (0, 0)),        # beta
        ],
        out_specs=pl.BlockSpec((tile_t, Hp),
                               lambda t, b, ids: (b * tiles_per_seq + t, 0)),
        scratch_shapes=[
            pltpu.VMEM((2, tile_t, Hp), word_table.dtype),
            pltpu.SemaphoreType.DMA((2,)),
        ],
    )

    # Rough live-VMEM estimate -> scoped-VMEM limit with headroom.
    est = (tile_t * Hp * (4 * tb + 2 * ob)      # pos/gather double buffers + out
           + 4 * tile_t * Hp * 4                # f32 temporaries
           + (2 * V * Hp * tb if table_in_vmem else 0)
           + 4 * Hp * tb)                       # gamma/beta
    vmem_limit = int(min(max(2 * est, 32 * 2**20), 64 * 2**20))

    kernel = functools.partial(
        _decoder_embeddings_kernel,
        tile_t=tile_t, seq_len=S, h_real=H, eps=eps, unroll=min(8, tile_t),
    )

    out_flat = pl.pallas_call(
        kernel,
        out_shape=jax.ShapeDtypeStruct((T, Hp), out_dtype),
        grid_spec=grid_spec,
        compiler_params=pltpu.CompilerParams(
            dimension_semantics=("parallel", "arbitrary"),
            vmem_limit_bytes=vmem_limit,
        ),
    )(flat_ids, word_table, pos_table, gamma.reshape(1, Hp), beta.reshape(1, Hp))

    out = out_flat.reshape(B, S, Hp)
    return out[..., :H] if Hp != H else out


def _reference(ids, word_table, pos_table, gamma, beta, eps=1e-5):
    we = word_table[ids]                                   # (B, S, H)
    pe = pos_table[jnp.arange(ids.shape[1])][None]         # (1, S, H)
    emb = we + pe
    mean = jnp.mean(emb, axis=-1, keepdims=True)
    var = jnp.mean(jnp.square(emb - mean), axis=-1, keepdims=True)
    return (emb - mean) / jnp.sqrt(var + eps) * gamma + beta


if __name__ == "__main__":
    # Module hyperparameters (small, consistent with the forward pass).
    vocab_size = 32
    hidden_dim = 32
    pad_token_id = 0
    max_position_embeddings = 16
    batch, seq = 2, 8

    key = jax.random.PRNGKey(0)
    k_ids, k_word, k_pos = jax.random.split(key, 3)

    # nn.Embedding-style N(0,1) init, padding row zeroed; LayerNorm gamma=1 / beta=0.
    word_table = jax.random.normal(k_word, (vocab_size, hidden_dim), jnp.float32)
    word_table = word_table.at[pad_token_id].set(0.0)
    pos_table = jax.random.normal(k_pos, (max_position_embeddings, hidden_dim),
                                  jnp.float32)
    gamma = jnp.ones((hidden_dim,), jnp.float32)
    beta = jnp.zeros((hidden_dim,), jnp.float32)
    ids = jax.random.randint(k_ids, (batch, seq), 0, vocab_size, dtype=jnp.int32)

    ref = _reference(ids, word_table, pos_table, gamma, beta)

    # Fast path: small table VMEM-resident, local row copies.
    out_fast = jax.block_until_ready(
        decoder_embeddings(ids, word_table, pos_table, gamma, beta))
    assert out_fast.shape == (batch, seq, hidden_dim)
    assert jnp.allclose(out_fast, ref, atol=1e-5, rtol=1e-5), "fast path mismatch"

    # Large-table path: HBM-resident table, double-buffered DMA row gather.
    out_dma = jax.block_until_ready(
        decoder_embeddings(ids, word_table, pos_table, gamma, beta,
                           force_hbm_gather=True))
    assert jnp.allclose(out_dma, ref, atol=1e-5, rtol=1e-5), "hbm gather path mismatch"

    print("KERNEL_OK")
</pallas_src>

<mosaic_0001>
module attributes {stable_mosaic.version = 11 : i64} {
  func.func @_decoder_embeddings_kernel(%arg0: i32, %arg1: i32, %arg2: memref<16xi32, #tpu.memory_space<smem>>, %arg3: memref<32x128xf32, #tpu.memory_space<vmem>>, %arg4: memref<8x128xf32, #tpu.memory_space<vmem>>, %arg5: memref<1x128xf32, #tpu.memory_space<vmem>>, %arg6: memref<1x128xf32, #tpu.memory_space<vmem>>, %arg7: memref<8x128xf32, #tpu.memory_space<vmem>>, %arg8: memref<2x8x128xf32, #tpu.memory_space<vmem>>, %arg9: memref<2x!tpu.dma_semaphore, #tpu.memory_space<semaphore_mem>>) attributes {dimension_semantics = [#tpu.dimension_semantics<parallel>, #tpu.dimension_semantics<arbitrary>], iteration_bounds = array<i64: 1, 2>, scalar_prefetch = 1 : i64, scratch_operands = 2 : i64, tpu.core_type = #tpu.core_type<tc>, window_params = [{pipeline_mode = #tpu.pipeline_mode<synchronous>, transform_indices = @transform_0, window_bounds = array<i64: 32, 128>}, {transform_indices = @transform_1, window_bounds = array<i64: 8, 128>}, {pipeline_mode = #tpu.pipeline_mode<synchronous>, transform_indices = @transform_2, window_bounds = array<i64: 1, 128>}, {pipeline_mode = #tpu.pipeline_mode<synchronous>, transform_indices = @transform_3, window_bounds = array<i64: 1, 128>}, {transform_indices = @transform_4, window_bounds = array<i64: 8, 128>}]} {
    %c8_i32 = arith.constant 8 : i32
    %0 = arith.muli %arg1, %c8_i32 : i32
    %c8_i32_0 = arith.constant 8 : i32
    %1 = arith.muli %arg0, %c8_i32_0 : i32
    %2 = arith.addi %0, %1 : i32
    %c2_i32 = arith.constant 2 : i32
    %c0_i32 = arith.constant 0 : i32
    %3 = arith.cmpi eq, %c2_i32, %c0_i32 : i32
    %c1_i32 = arith.constant 1 : i32
    %4 = arith.select %3, %c1_i32, %c2_i32 : i32
    %5 = arith.remsi %arg1, %4 : i32
    %c0_i32_1 = arith.constant 0 : i32
    %6 = arith.cmpi ne, %5, %c0_i32_1 : i32
    %c0_i32_2 = arith.constant 0 : i32
    %7 = arith.cmpi slt, %5, %c0_i32_2 : i32
    %c0_i32_3 = arith.constant 0 : i32
    %8 = arith.cmpi slt, %4, %c0_i32_3 : i32
    %9 = arith.xori %7, %8 : i1
    %10 = arith.andi %9, %6 : i1
    %11 = arith.addi %5, %4 : i32
    %12 = arith.select %10, %11, %5 : i32
    %c0_i32_4 = arith.constant 0 : i32
    %13 = arith.cmpi eq, %arg1, %c0_i32_4 : i32
    %14 = arith.extui %13 : i1 to i32
    %c0_i32_5 = arith.constant 0 : i32
    %15 = arith.cmpi ne, %14, %c0_i32_5 : i32
    scf.if %15 {
      %c0_i32_58 = arith.constant 0 : i32
      %101 = arith.addi %2, %c0_i32_58 : i32
      %102 = arith.index_cast %101 : i32 to index
      %103 = memref.load %arg2[%102] : memref<16xi32, #tpu.memory_space<smem>>
      %c0_i32_59 = arith.constant 0 : i32
      %c0_i32_60 = arith.constant 0 : i32
      %c0_i32_61 = arith.constant 0 : i32
      %104 = tpu.memref_slice %arg3[%103, %c0_i32_61] : memref<32x128xf32, #tpu.memory_space<vmem>> -> memref<1x128xf32, #tpu.memory_space<vmem>>
      %c0_i32_62 = arith.constant 0 : i32
      %105 = tpu.memref_slice %arg8[%c0_i32_59, %c0_i32_58, %c0_i32_62] : memref<2x8x128xf32, #tpu.memory_space<vmem>> -> memref<1x1x128xf32, #tpu.memory_space<vmem>>
      %106 = tpu.memref_squeeze %105 : memref<1x1x128xf32, #tpu.memory_space<vmem>> -> memref<1x128xf32, #tpu.memory_space<vmem>>
      %107 = tpu.memref_slice %arg9[%c0_i32_60] : memref<2x!tpu.dma_semaphore, #tpu.memory_space<semaphore_mem>> -> memref<1x!tpu.dma_semaphore, #tpu.memory_space<semaphore_mem>>
      %108 = tpu.memref_squeeze %107 : memref<1x!tpu.dma_semaphore, #tpu.memory_space<semaphore_mem>> -> memref<!tpu.dma_semaphore, #tpu.memory_space<semaphore_mem>>
      tpu.enqueue_dma source(%104 : memref<1x128xf32, #tpu.memory_space<vmem>>) target(%106 : memref<1x128xf32, #tpu.memory_space<vmem>>) target_semaphore(%108 : memref<!tpu.dma_semaphore, #tpu.memory_space<semaphore_mem>>)
      %c1_i32_63 = arith.constant 1 : i32
      %109 = arith.addi %2, %c1_i32_63 : i32
      %110 = arith.index_cast %109 : i32 to index
      %111 = memref.load %arg2[%110] : memref<16xi32, #tpu.memory_space<smem>>
      %c0_i32_64 = arith.constant 0 : i32
      %c0_i32_65 = arith.constant 0 : i32
      %c0_i32_66 = arith.constant 0 : i32
      %112 = tpu.memref_slice %arg3[%111, %c0_i32_66] : memref<32x128xf32, #tpu.memory_space<vmem>> -> memref<1x128xf32, #tpu.memory_space<vmem>>
      %c0_i32_67 = arith.constant 0 : i32
      %113 = tpu.memref_slice %arg8[%c0_i32_64, %c1_i32_63, %c0_i32_67] : memref<2x8x128xf32, #tpu.memory_space<vmem>> -> memref<1x1x128xf32, #tpu.memory_space<vmem>>
      %114 = tpu.memref_squeeze %113 : memref<1x1x128xf32, #tpu.memory_space<vmem>> -> memref<1x128xf32, #tpu.memory_space<vmem>>
      %115 = tpu.memref_slice %arg9[%c0_i32_65] : memref<2x!tpu.dma_semaphore, #tpu.memory_space<semaphore_mem>> -> memref<1x!tpu.dma_semaphore, #tpu.memory_space<semaphore_mem>>
      %116 = tpu.memref_squeeze %115 : memref<1x!tpu.dma_semaphore, #tpu.memory_space<semaphore_mem>> -> memref<!tpu.dma_semaphore, #tpu.memory_space<semaphore_mem>>
      tpu.enqueue_dma source(%112 : memref<1x128xf32, #tpu.memory_space<vmem>>) target(%114 : memref<1x128xf32, #tpu.memory_space<vmem>>) target_semaphore(%116 : memref<!tpu.dma_semaphore, #tpu.memory_space<semaphore_mem>>)
      %c2_i32_68 = arith.constant 2 : i32
      %117 = arith.addi %2, %c2_i32_68 : i32
      %118 = arith.index_cast %117 : i32 to index
      %119 = memref.load %arg2[%118] : memref<16xi32, #tpu.memory_space<smem>>
      %c0_i32_69 = arith.constant 0 : i32
      %c0_i32_70 = arith.constant 0 : i32
      %c0_i32_71 = arith.constant 0 : i32
      %120 = tpu.memref_slice %arg3[%119, %c0_i32_71] : memref<32x128xf32, #tpu.memory_space<vmem>> -> memref<1x128xf32, #tpu.memory_space<vmem>>
      %c0_i32_72 = arith.constant 0 : i32
      %121 = tpu.memref_slice %arg8[%c0_i32_69, %c2_i32_68, %c0_i32_72] : memref<2x8x128xf32, #tpu.memory_space<vmem>> -> memref<1x1x128xf32, #tpu.memory_space<vmem>>
      %122 = tpu.memref_squeeze %121 : memref<1x1x128xf32, #tpu.memory_space<vmem>> -> memref<1x128xf32, #tpu.memory_space<vmem>>
      %123 = tpu.memref_slice %arg9[%c0_i32_70] : memref<2x!tpu.dma_semaphore, #tpu.memory_space<semaphore_mem>> -> memref<1x!tpu.dma_semaphore, #tpu.memory_space<semaphore_mem>>
      %124 = tpu.memref_squeeze %123 : memref<1x!tpu.dma_semaphore, #tpu.memory_space<semaphore_mem>> -> memref<!tpu.dma_semaphore, #tpu.memory_space<semaphore_mem>>
      tpu.enqueue_dma source(%120 : memref<1x128xf32, #tpu.memory_space<vmem>>) target(%122 : memref<1x128xf32, #tpu.memory_space<vmem>>) target_semaphore(%124 : memref<!tpu.dma_semaphore, #tpu.memory_space<semaphore_mem>>)
      %c3_i32_73 = arith.constant 3 : i32
      %125 = arith.addi %2, %c3_i32_73 : i32
      %126 = arith.index_cast %125 : i32 to index
      %127 = memref.load %arg2[%126] : memref<16xi32, #tpu.memory_space<smem>>
      %c0_i32_74 = arith.constant 0 : i32
      %c0_i32_75 = arith.constant 0 : i32
      %c0_i32_76 = arith.constant 0 : i32
      %128 = tpu.memref_slice %arg3[%127, %c0_i32_76] : memref<32x128xf32, #tpu.memory_space<vmem>> -> memref<1x128xf32, #tpu.memory_space<vmem>>
      %c0_i32_77 = arith.constant 0 : i32
      %129 = tpu.memref_slice %arg8[%c0_i32_74, %c3_i32_73, %c0_i32_77] : memref<2x8x128xf32, #tpu.memory_space<vmem>> -> memref<1x1x128xf32, #tpu.memory_space<vmem>>
      %130 = tpu.memref_squeeze %129 : memref<1x1x128xf32, #tpu.memory_space<vmem>> -> memref<1x128xf32, #tpu.memory_space<vmem>>
      %131 = tpu.memref_slice %arg9[%c0_i32_75] : memref<2x!tpu.dma_semaphore, #tpu.memory_space<semaphore_mem>> -> memref<1x!tpu.dma_semaphore, #tpu.memory_space<semaphore_mem>>
      %132 = tpu.memref_squeeze %131 : memref<1x!tpu.dma_semaphore, #tpu.memory_space<semaphore_mem>> -> memref<!tpu.dma_semaphore, #tpu.memory_space<semaphore_mem>>
      tpu.enqueue_dma source(%128 : memref<1x128xf32, #tpu.memory_space<vmem>>) target(%130 : memref<1x128xf32, #tpu.memory_space<vmem>>) target_semaphore(%132 : memref<!tpu.dma_semaphore, #tpu.memory_space<semaphore_mem>>)
      %c4_i32_78 = arith.constant 4 : i32
      %133 = arith.addi %2, %c4_i32_78 : i32
      %134 = arith.index_cast %133 : i32 to index
      %135 = memref.load %arg2[%134] : memref<16xi32, #tpu.memory_space<smem>>
      %c0_i32_79 = arith.constant 0 : i32
      %c0_i32_80 = arith.constant 0 : i32
      %c0_i32_81 = arith.constant 0 : i32
      %136 = tpu.memref_slice %arg3[%135, %c0_i32_81] : memref<32x128xf32, #tpu.memory_space<vmem>> -> memref<1x128xf32, #tpu.memory_space<vmem>>
      %c0_i32_82 = arith.constant 0 : i32
      %137 = tpu.memref_slice %arg8[%c0_i32_79, %c4_i32_78, %c0_i32_82] : memref<2x8x128xf32, #tpu.memory_space<vmem>> -> memref<1x1x128xf32, #tpu.memory_space<vmem>>
      %138 = tpu.memref_squeeze %137 : memref<1x1x128xf32, #tpu.memory_space<vmem>> -> memref<1x128xf32, #tpu.memory_space<vmem>>
      %139 = tpu.memref_slice %arg9[%c0_i32_80] : memref<2x!tpu.dma_semaphore, #tpu.memory_space<semaphore_mem>> -> memref<1x!tpu.dma_semaphore, #tpu.memory_space<semaphore_mem>>
      %140 = tpu.memref_squeeze %139 : memref<1x!tpu.dma_semaphore, #tpu.memory_space<semaphore_mem>> -> memref<!tpu.dma_semaphore, #tpu.memory_space<semaphore_mem>>
      tpu.enqueue_dma source(%136 : memref<1x128xf32, #tpu.memory_space<vmem>>) target(%138 : memref<1x128xf32, #tpu.memory_space<vmem>>) target_semaphore(%140 : memref<!tpu.dma_semaphore, #tpu.memory_space<semaphore_mem>>)
      %c5_i32_83 = arith.constant 5 : i32
      %141 = arith.addi %2, %c5_i32_83 : i32
      %142 = arith.index_cast %141 : i32 to index
      %143 = memref.load %arg2[%142] : memref<16xi32, #tpu.memory_space<smem>>
      %c0_i32_84 = arith.constant 0 : i32
      %c0_i32_85 = arith.constant 0 : i32
      %c0_i32_86 = arith.constant 0 : i32
      %144 = tpu.memref_slice %arg3[%143, %c0_i32_86] : memref<32x128xf32, #tpu.memory_space<vmem>> -> memref<1x128xf32, #tpu.memory_space<vmem>>
      %c0_i32_87 = arith.constant 0 : i32
      %145 = tpu.memref_slice %arg8[%c0_i32_84, %c5_i32_83, %c0_i32_87] : memref<2x8x128xf32, #tpu.memory_space<vmem>> -> memref<1x1x128xf32, #tpu.memory_space<vmem>>
      %146 = tpu.memref_squeeze %145 : memref<1x1x128xf32, #tpu.memory_space<vmem>> -> memref<1x128xf32, #tpu.memory_space<vmem>>
      %147 = tpu.memref_slice %arg9[%c0_i32_85] : memref<2x!tpu.dma_semaphore, #tpu.memory_space<semaphore_mem>> -> memref<1x!tpu.dma_semaphore, #tpu.memory_space<semaphore_mem>>
      %148 = tpu.memref_squeeze %147 : memref<1x!tpu.dma_semaphore, #tpu.memory_space<semaphore_mem>> -> memref<!tpu.dma_semaphore, #tpu.memory_space<semaphore_mem>>
      tpu.enqueue_dma source(%144 : memref<1x128xf32, #tpu.memory_space<vmem>>) target(%146 : memref<1x128xf32, #tpu.memory_space<vmem>>) target_semaphore(%148 : memref<!tpu.dma_semaphore, #tpu.memory_space<semaphore_mem>>)
      %c6_i32_88 = arith.constant 6 : i32
      %149 = arith.addi %2, %c6_i32_88 : i32
      %150 = arith.index_cast %149 : i32 to index
      %151 = memref.load %arg2[%150] : memref<16xi32, #tpu.memory_space<smem>>
      %c0_i32_89 = arith.constant 0 : i32
      %c0_i32_90 = arith.constant 0 : i32
      %c0_i32_91 = arith.constant 0 : i32
      %152 = tpu.memref_slice %arg3[%151, %c0_i32_91] : memref<32x128xf32, #tpu.memory_space<vmem>> -> memref<1x128xf32, #tpu.memory_space<vmem>>
      %c0_i32_92 = arith.constant 0 : i32
      %153 = tpu.memref_slice %arg8[%c0_i32_89, %c6_i32_88, %c0_i32_92] : memref<2x8x128xf32, #tpu.memory_space<vmem>> -> memref<1x1x128xf32, #tpu.memory_space<vmem>>
      %154 = tpu.memref_squeeze %153 : memref<1x1x128xf32, #tpu.memory_space<vmem>> -> memref<1x128xf32, #tpu.memory_space<vmem>>
      %155 = tpu.memref_slice %arg9[%c0_i32_90] : memref<2x!tpu.dma_semaphore, #tpu.memory_space<semaphore_mem>> -> memref<1x!tpu.dma_semaphore, #tpu.memory_space<semaphore_mem>>
      %156 = tpu.memref_squeeze %155 : memref<1x!tpu.dma_semaphore, #tpu.memory_space<semaphore_mem>> -> memref<!tpu.dma_semaphore, #tpu.memory_space<semaphore_mem>>
      tpu.enqueue_dma source(%152 : memref<1x128xf32, #tpu.memory_space<vmem>>) target(%154 : memref<1x128xf32, #tpu.memory_space<vmem>>) target_semaphore(%156 : memref<!tpu.dma_semaphore, #tpu.memory_space<semaphore_mem>>)
      %c7_i32_93 = arith.constant 7 : i32
      %157 = arith.addi %2, %c7_i32_93 : i32
      %158 = arith.index_cast %157 : i32 to index
      %159 = memref.load %arg2[%158] : memref<16xi32, #tpu.memory_space<smem>>
      %c0_i32_94 = arith.constant 0 : i32
      %c0_i32_95 = arith.constant 0 : i32
      %c0_i32_96 = arith.constant 0 : i32
      %160 = tpu.memref_slice %arg3[%159, %c0_i32_96] : memref<32x128xf32, #tpu.memory_space<vmem>> -> memref<1x128xf32, #tpu.memory_space<vmem>>
      %c0_i32_97 = arith.constant 0 : i32
      %161 = tpu.memref_slice %arg8[%c0_i32_94, %c7_i32_93, %c0_i32_97] : memref<2x8x128xf32, #tpu.memory_space<vmem>> -> memref<1x1x128xf32, #tpu.memory_space<vmem>>
      %162 = tpu.memref_squeeze %161 : memref<1x1x128xf32, #tpu.memory_space<vmem>> -> memref<1x128xf32, #tpu.memory_space<vmem>>
      %163 = tpu.memref_slice %arg9[%c0_i32_95] : memref<2x!tpu.dma_semaphore, #tpu.memory_space<semaphore_mem>> -> memref<1x!tpu.dma_semaphore, #tpu.memory_space<semaphore_mem>>
      %164 = tpu.memref_squeeze %163 : memref<1x!tpu.dma_semaphore, #tpu.memory_space<semaphore_mem>> -> memref<!tpu.dma_semaphore, #tpu.memory_space<semaphore_mem>>
      tpu.enqueue_dma source(%160 : memref<1x128xf32, #tpu.memory_space<vmem>>) target(%162 : memref<1x128xf32, #tpu.memory_space<vmem>>) target_semaphore(%164 : memref<!tpu.dma_semaphore, #tpu.memory_space<semaphore_mem>>)
      %c8_i32_98 = arith.constant 8 : i32
    } else {
    }
    %c1_i32_6 = arith.constant 1 : i32
    %16 = arith.addi %arg1, %c1_i32_6 : i32
    %c2_i32_7 = arith.constant 2 : i32
    %17 = arith.cmpi slt, %16, %c2_i32_7 : i32
    %18 = arith.extui %17 : i1 to i32
    %c0_i32_8 = arith.constant 0 : i32
    %19 = arith.cmpi ne, %18, %c0_i32_8 : i32
    scf.if %19 {
      %c8_i32_58 = arith.constant 8 : i32
      %101 = arith.addi %2, %c8_i32_58 : i32
      %c1_i32_59 = arith.constant 1 : i32
      %102 = arith.subi %c1_i32_59, %12 : i32
      %c0_i32_60 = arith.constant 0 : i32
      %103 = arith.addi %101, %c0_i32_60 : i32
      %104 = arith.index_cast %103 : i32 to index
      %105 = memref.load %arg2[%104] : memref<16xi32, #tpu.memory_space<smem>>
      %c0_i32_61 = arith.constant 0 : i32
      %106 = tpu.memref_slice %arg3[%105, %c0_i32_61] : memref<32x128xf32, #tpu.memory_space<vmem>> -> memref<1x128xf32, #tpu.memory_space<vmem>>
      %c0_i32_62 = arith.constant 0 : i32
      %107 = tpu.memref_slice %arg8[%102, %c0_i32_60, %c0_i32_62] : memref<2x8x128xf32, #tpu.memory_space<vmem>> -> memref<1x1x128xf32, #tpu.memory_space<vmem>>
      %108 = tpu.memref_squeeze %107 : memref<1x1x128xf32, #tpu.memory_space<vmem>> -> memref<1x128xf32, #tpu.memory_space<vmem>>
      %109 = tpu.memref_slice %arg9[%102] : memref<2x!tpu.dma_semaphore, #tpu.memory_space<semaphore_mem>> -> memref<1x!tpu.dma_semaphore, #tpu.memory_space<semaphore_mem>>
      %110 = tpu.memref_squeeze %109 : memref<1x!tpu.dma_semaphore, #tpu.memory_space<semaphore_mem>> -> memref<!tpu.dma_semaphore, #tpu.memory_space<semaphore_mem>>
      tpu.enqueue_dma source(%106 : memref<1x128xf32, #tpu.memory_space<vmem>>) target(%108 : memref<1x128xf32, #tpu.memory_space<vmem>>) target_semaphore(%110 : memref<!tpu.dma_semaphore, #tpu.memory_space<semaphore_mem>>)
      %c1_i32_63 = arith.constant 1 : i32
      %111 = arith.addi %101, %c1_i32_63 : i32
      %112 = arith.index_cast %111 : i32 to index
      %113 = memref.load %arg2[%112] : memref<16xi32, #tpu.memory_space<smem>>
      %c0_i32_64 = arith.constant 0 : i32
      %114 = tpu.memref_slice %arg3[%113, %c0_i32_64] : memref<32x128xf32, #tpu.memory_space<vmem>> -> memref<1x128xf32, #tpu.memory_space<vmem>>
      %c0_i32_65 = arith.constant 0 : i32
      %115 = tpu.memref_slice %arg8[%102, %c1_i32_63, %c0_i32_65] : memref<2x8x128xf32, #tpu.memory_space<vmem>> -> memref<1x1x128xf32, #tpu.memory_space<vmem>>
      %116 = tpu.memref_squeeze %115 : memref<1x1x128xf32, #tpu.memory_space<vmem>> -> memref<1x128xf32, #tpu.memory_space<vmem>>
      %117 = tpu.memref_slice %arg9[%102] : memref<2x!tpu.dma_semaphore, #tpu.memory_space<semaphore_mem>> -> memref<1x!tpu.dma_semaphore, #tpu.memory_space<semaphore_mem>>
      %118 = tpu.memref_squeeze %117 : memref<1x!tpu.dma_semaphore, #tpu.memory_space<semaphore_mem>> -> memref<!tpu.dma_semaphore, #tpu.memory_space<semaphore_mem>>
      tpu.enqueue_dma source(%114 : memref<1x128xf32, #tpu.memory_space<vmem>>) target(%116 : memref<1x128xf32, #tpu.memory_space<vmem>>) target_semaphore(%118 : memref<!tpu.dma_semaphore, #tpu.memory_space<semaphore_mem>>)
      %c2_i32_66 = arith.constant 2 : i32
      %119 = arith.addi %101, %c2_i32_66 : i32
      %120 = arith.index_cast %119 : i32 to index
      %121 = memref.load %arg2[%120] : memref<16xi32, #tpu.memory_space<smem>>
      %c0_i32_67 = arith.constant 0 : i32
      %122 = tpu.memref_slice %arg3[%121, %c0_i32_67] : memref<32x128xf32, #tpu.memory_space<vmem>> -> memref<1x128xf32, #tpu.memory_space<vmem>>
      %c0_i32_68 = arith.constant 0 : i32
      %123 = tpu.memref_slice %arg8[%102, %c2_i32_66, %c0_i32_68] : memref<2x8x128xf32, #tpu.memory_space<vmem>> -> memref<1x1x128xf32, #tpu.memory_space<vmem>>
      %124 = tpu.memref_squeeze %123 : memref<1x1x128xf32, #tpu.memory_space<vmem>> -> memref<1x128xf32, #tpu.memory_space<vmem>>
      %125 = tpu.memref_slice %arg9[%102] : memref<2x!tpu.dma_semaphore, #tpu.memory_space<semaphore_mem>> -> memref<1x!tpu.dma_semaphore, #tpu.memory_space<semaphore_mem>>
      %126 = tpu.memref_squeeze %125 : memref<1x!tpu.dma_semaphore, #tpu.memory_space<semaphore_mem>> -> memref<!tpu.dma_semaphore, #tpu.memory_space<semaphore_mem>>
      tpu.enqueue_dma source(%122 : memref<1x128xf32, #tpu.memory_space<vmem>>) target(%124 : memref<1x128xf32, #tpu.memory_space<vmem>>) target_semaphore(%126 : memref<!tpu.dma_semaphore, #tpu.memory_space<semaphore_mem>>)
      %c3_i32_69 = arith.constant 3 : i32
      %127 = arith.addi %101, %c3_i32_69 : i32
      %128 = arith.index_cast %127 : i32 to index
      %129 = memref.load %arg2[%128] : memref<16xi32, #tpu.memory_space<smem>>
      %c0_i32_70 = arith.constant 0 : i32
      %130 = tpu.memref_slice %arg3[%129, %c0_i32_70] : memref<32x128xf32, #tpu.memory_space<vmem>> -> memref<1x128xf32, #tpu.memory_space<vmem>>
      %c0_i32_71 = arith.constant 0 : i32
      %131 = tpu.memref_slice %arg8[%102, %c3_i32_69, %c0_i32_71] : memref<2x8x128xf32, #tpu.memory_space<vmem>> -> memref<1x1x128xf32, #tpu.memory_space<vmem>>
      %132 = tpu.memref_squeeze %131 : memref<1x1x128xf32, #tpu.memory_space<vmem>> -> memref<1x128xf32, #tpu.memory_space<vmem>>
      %133 = tpu.memref_slice %arg9[%102] : memref<2x!tpu.dma_semaphore, #tpu.memory_space<semaphore_mem>> -> memref<1x!tpu.dma_semaphore, #tpu.memory_space<semaphore_mem>>
      %134 = tpu.memref_squeeze %133 : memref<1x!tpu.dma_semaphore, #tpu.memory_space<semaphore_mem>> -> memref<!tpu.dma_semaphore, #tpu.memory_space<semaphore_mem>>
      tpu.enqueue_dma source(%130 : memref<1x128xf32, #tpu.memory_space<vmem>>) target(%132 : memref<1x128xf32, #tpu.memory_space<vmem>>) target_semaphore(%134 : memref<!tpu.dma_semaphore, #tpu.memory_space<semaphore_mem>>)
      %c4_i32_72 = arith.constant 4 : i32
      %135 = arith.addi %101, %c4_i32_72 : i32
      %136 = arith.index_cast %135 : i32 to index
      %137 = memref.load %arg2[%136] : memref<16xi32, #tpu.memory_space<smem>>
      %c0_i32_73 = arith.constant 0 : i32
      %138 = tpu.memref_slice %arg3[%137, %c0_i32_73] : memref<32x128xf32, #tpu.memory_space<vmem>> -> memref<1x128xf32, #tpu.memory_space<vmem>>
      %c0_i32_74 = arith.constant 0 : i32
      %139 = tpu.memref_slice %arg8[%102, %c4_i32_72, %c0_i32_74] : memref<2x8x128xf32, #tpu.memory_space<vmem>> -> memref<1x1x128xf32, #tpu.memory_space<vmem>>
      %140 = tpu.memref_squeeze %139 : memref<1x1x128xf32, #tpu.memory_space<vmem>> -> memref<1x128xf32, #tpu.memory_space<vmem>>
      %141 = tpu.memref_slice %arg9[%102] : memref<2x!tpu.dma_semaphore, #tpu.memory_space<semaphore_mem>> -> memref<1x!tpu.dma_semaphore, #tpu.memory_space<semaphore_mem>>
      %142 = tpu.memref_squeeze %141 : memref<1x!tpu.dma_semaphore, #tpu.memory_space<semaphore_mem>> -> memref<!tpu.dma_semaphore, #tpu.memory_space<semaphore_mem>>
      tpu.enqueue_dma source(%138 : memref<1x128xf32, #tpu.memory_space<vmem>>) target(%140 : memref<1x128xf32, #tpu.memory_space<vmem>>) target_semaphore(%142 : memref<!tpu.dma_semaphore, #tpu.memory_space<semaphore_mem>>)
      %c5_i32_75 = arith.constant 5 : i32
      %143 = arith.addi %101, %c5_i32_75 : i32
      %144 = arith.index_cast %143 : i32 to index
      %145 = memref.load %arg2[%144] : memref<16xi32, #tpu.memory_space<smem>>
      %c0_i32_76 = arith.constant 0 : i32
      %146 = tpu.memref_slice %arg3[%145, %c0_i32_76] : memref<32x128xf32, #tpu.memory_space<vmem>> -> memref<1x128xf32, #tpu.memory_space<vmem>>
      %c0_i32_77 = arith.constant 0 : i32
      %147 = tpu.memref_slice %arg8[%102, %c5_i32_75, %c0_i32_77] : memref<2x8x128xf32, #tpu.memory_space<vmem>> -> memref<1x1x128xf32, #tpu.memory_space<vmem>>
      %148 = tpu.memref_squeeze %147 : memref<1x1x128xf32, #tpu.memory_space<vmem>> -> memref<1x128xf32, #tpu.memory_space<vmem>>
      %149 = tpu.memref_slice %arg9[%102] : memref<2x!tpu.dma_semaphore, #tpu.memory_space<semaphore_mem>> -> memref<1x!tpu.dma_semaphore, #tpu.memory_space<semaphore_mem>>
      %150 = tpu.memref_squeeze %149 : memref<1x!tpu.dma_semaphore, #tpu.memory_space<semaphore_mem>> -> memref<!tpu.dma_semaphore, #tpu.memory_space<semaphore_mem>>
      tpu.enqueue_dma source(%146 : memref<1x128xf32, #tpu.memory_space<vmem>>) target(%148 : memref<1x128xf32, #tpu.memory_space<vmem>>) target_semaphore(%150 : memref<!tpu.dma_semaphore, #tpu.memory_space<semaphore_mem>>)
      %c6_i32_78 = arith.constant 6 : i32
      %151 = arith.addi %101, %c6_i32_78 : i32
      %152 = arith.index_cast %151 : i32 to index
      %153 = memref.load %arg2[%152] : memref<16xi32, #tpu.memory_space<smem>>
      %c0_i32_79 = arith.constant 0 : i32
      %154 = tpu.memref_slice %arg3[%153, %c0_i32_79] : memref<32x128xf32, #tpu.memory_space<vmem>> -> memref<1x128xf32, #tpu.memory_space<vmem>>
      %c0_i32_80 = arith.constant 0 : i32
      %155 = tpu.memref_slice %arg8[%102, %c6_i32_78, %c0_i32_80] : memref<2x8x128xf32, #tpu.memory_space<vmem>> -> memref<1x1x128xf32, #tpu.memory_space<vmem>>
      %156 = tpu.memref_squeeze %155 : memref<1x1x128xf32, #tpu.memory_space<vmem>> -> memref<1x128xf32, #tpu.memory_space<vmem>>
      %157 = tpu.memref_slice %arg9[%102] : memref<2x!tpu.dma_semaphore, #tpu.memory_space<semaphore_mem>> -> memref<1x!tpu.dma_semaphore, #tpu.memory_space<semaphore_mem>>
      %158 = tpu.memref_squeeze %157 : memref<1x!tpu.dma_semaphore, #tpu.memory_space<semaphore_mem>> -> memref<!tpu.dma_semaphore, #tpu.memory_space<semaphore_mem>>
      tpu.enqueue_dma source(%154 : memref<1x128xf32, #tpu.memory_space<vmem>>) target(%156 : memref<1x128xf32, #tpu.memory_space<vmem>>) target_semaphore(%158 : memref<!tpu.dma_semaphore, #tpu.memory_space<semaphore_mem>>)
      %c7_i32_81 = arith.constant 7 : i32
      %159 = arith.addi %101, %c7_i32_81 : i32
      %160 = arith.index_cast %159 : i32 to index
      %161 = memref.load %arg2[%160] : memref<16xi32, #tpu.memory_space<smem>>
      %c0_i32_82 = arith.constant 0 : i32
      %162 = tpu.memref_slice %arg3[%161, %c0_i32_82] : memref<32x128xf32, #tpu.memory_space<vmem>> -> memref<1x128xf32, #tpu.memory_space<vmem>>
      %c0_i32_83 = arith.constant 0 : i32
      %163 = tpu.memref_slice %arg8[%102, %c7_i32_81, %c0_i32_83] : memref<2x8x128xf32, #tpu.memory_space<vmem>> -> memref<1x1x128xf32, #tpu.memory_space<vmem>>
      %164 = tpu.memref_squeeze %163 : memref<1x1x128xf32, #tpu.memory_space<vmem>> -> memref<1x128xf32, #tpu.memory_space<vmem>>
      %165 = tpu.memref_slice %arg9[%102] : memref<2x!tpu.dma_semaphore, #tpu.memory_space<semaphore_mem>> -> memref<1x!tpu.dma_semaphore, #tpu.memory_space<semaphore_mem>>
      %166 = tpu.memref_squeeze %165 : memref<1x!tpu.dma_semaphore, #tpu.memory_space<semaphore_mem>> -> memref<!tpu.dma_semaphore, #tpu.memory_space<semaphore_mem>>
      tpu.enqueue_dma source(%162 : memref<1x128xf32, #tpu.memory_space<vmem>>) target(%164 : memref<1x128xf32, #tpu.memory_space<vmem>>) target_semaphore(%166 : memref<!tpu.dma_semaphore, #tpu.memory_space<semaphore_mem>>)
      %c8_i32_84 = arith.constant 8 : i32
    } else {
    }
    %c0_i32_9 = arith.constant 0 : i32
    %c0_i32_10 = arith.constant 0 : i32
    %c0_i32_11 = arith.constant 0 : i32
    %20 = tpu.memref_slice %arg8[%12, %c0_i32_10, %c0_i32_11] : memref<2x8x128xf32, #tpu.memory_space<vmem>> -> memref<1x1x128xf32, #tpu.memory_space<vmem>>
    %21 = tpu.memref_squeeze %20 : memref<1x1x128xf32, #tpu.memory_space<vmem>> -> memref<1x128xf32, #tpu.memory_space<vmem>>
    %c0_i32_12 = arith.constant 0 : i32
    %c0_i32_13 = arith.constant 0 : i32
    %22 = tpu.memref_slice %arg8[%12, %c0_i32_12, %c0_i32_13] : memref<2x8x128xf32, #tpu.memory_space<vmem>> -> memref<1x1x128xf32, #tpu.memory_space<vmem>>
    %23 = tpu.memref_squeeze %22 : memref<1x1x128xf32, #tpu.memory_space<vmem>> -> memref<1x128xf32, #tpu.memory_space<vmem>>
    %24 = tpu.memref_slice %arg9[%12] : memref<2x!tpu.dma_semaphore, #tpu.memory_space<semaphore_mem>> -> memref<1x!tpu.dma_semaphore, #tpu.memory_space<semaphore_mem>>
    %25 = tpu.memref_squeeze %24 : memref<1x!tpu.dma_semaphore, #tpu.memory_space<semaphore_mem>> -> memref<!tpu.dma_semaphore, #tpu.memory_space<semaphore_mem>>
    tpu.wait_dma2 semaphore(%25 : memref<!tpu.dma_semaphore, #tpu.memory_space<semaphore_mem>>) src(%21 : memref<1x128xf32, #tpu.memory_space<vmem>>) dst(%23 : memref<1x128xf32, #tpu.memory_space<vmem>>)
    %c1_i32_14 = arith.constant 1 : i32
    %c0_i32_15 = arith.constant 0 : i32
    %c0_i32_16 = arith.constant 0 : i32
    %26 = tpu.memref_slice %arg8[%12, %c0_i32_15, %c0_i32_16] : memref<2x8x128xf32, #tpu.memory_space<vmem>> -> memref<1x1x128xf32, #tpu.memory_space<vmem>>
    %27 = tpu.memref_squeeze %26 : memref<1x1x128xf32, #tpu.memory_space<vmem>> -> memref<1x128xf32, #tpu.memory_space<vmem>>
    %c0_i32_17 = arith.constant 0 : i32
    %c0_i32_18 = arith.constant 0 : i32
    %28 = tpu.memref_slice %arg8[%12, %c0_i32_17, %c0_i32_18] : memref<2x8x128xf32, #tpu.memory_space<vmem>> -> memref<1x1x128xf32, #tpu.memory_space<vmem>>
    %29 = tpu.memref_squeeze %28 : memref<1x1x128xf32, #tpu.memory_space<vmem>> -> memref<1x128xf32, #tpu.memory_space<vmem>>
    %30 = tpu.memref_slice %arg9[%12] : memref<2x!tpu.dma_semaphore, #tpu.memory_space<semaphore_mem>> -> memref<1x!tpu.dma_semaphore, #tpu.memory_space<semaphore_mem>>
    %31 = tpu.memref_squeeze %30 : memref<1x!tpu.dma_semaphore, #tpu.memory_space<semaphore_mem>> -> memref<!tpu.dma_semaphore, #tpu.memory_space<semaphore_mem>>
    tpu.wait_dma2 semaphore(%31 : memref<!tpu.dma_semaphore, #tpu.memory_space<semaphore_mem>>) src(%27 : memref<1x128xf32, #tpu.memory_space<vmem>>) dst(%29 : memref<1x128xf32, #tpu.memory_space<vmem>>)
    %c2_i32_19 = arith.constant 2 : i32
    %c0_i32_20 = arith.constant 0 : i32
    %c0_i32_21 = arith.constant 0 : i32
    %32 = tpu.memref_slice %arg8[%12, %c0_i32_20, %c0_i32_21] : memref<2x8x128xf32, #tpu.memory_space<vmem>> -> memref<1x1x128xf32, #tpu.memory_space<vmem>>
    %33 = tpu.memref_squeeze %32 : memref<1x1x128xf32, #tpu.memory_space<vmem>> -> memref<1x128xf32, #tpu.memory_space<vmem>>
    %c0_i32_22 = arith.constant 0 : i32
    %c0_i32_23 = arith.constant 0 : i32
    %34 = tpu.memref_slice %arg8[%12, %c0_i32_22, %c0_i32_23] : memref<2x8x128xf32, #tpu.memory_space<vmem>> -> memref<1x1x128xf32, #tpu.memory_space<vmem>>
    %35 = tpu.memref_squeeze %34 : memref<1x1x128xf32, #tpu.memory_space<vmem>> -> memref<1x128xf32, #tpu.memory_space<vmem>>
    %36 = tpu.memref_slice %arg9[%12] : memref<2x!tpu.dma_semaphore, #tpu.memory_space<semaphore_mem>> -> memref<1x!tpu.dma_semaphore, #tpu.memory_space<semaphore_mem>>
    %37 = tpu.memref_squeeze %36 : memref<1x!tpu.dma_semaphore, #tpu.memory_space<semaphore_mem>> -> memref<!tpu.dma_semaphore, #tpu.memory_space<semaphore_mem>>
    tpu.wait_dma2 semaphore(%37 : memref<!tpu.dma_semaphore, #tpu.memory_space<semaphore_mem>>) src(%33 : memref<1x128xf32, #tpu.memory_space<vmem>>) dst(%35 : memref<1x128xf32, #tpu.memory_space<vmem>>)
    %c3_i32 = arith.constant 3 : i32
    %c0_i32_24 = arith.constant 0 : i32
    %c0_i32_25 = arith.constant 0 : i32
    %38 = tpu.memref_slice %arg8[%12, %c0_i32_24, %c0_i32_25] : memref<2x8x128xf32, #tpu.memory_space<vmem>> -> memref<1x1x128xf32, #tpu.memory_space<vmem>>
    %39 = tpu.memref_squeeze %38 : memref<1x1x128xf32, #tpu.memory_space<vmem>> -> memref<1x128xf32, #tpu.memory_space<vmem>>
    %c0_i32_26 = arith.constant 0 : i32
    %c0_i32_27 = arith.constant 0 : i32
    %40 = tpu.memref_slice %arg8[%12, %c0_i32_26, %c0_i32_27] : memref<2x8x128xf32, #tpu.memory_space<vmem>> -> memref<1x1x128xf32, #tpu.memory_space<vmem>>
    %41 = tpu.memref_squeeze %40 : memref<1x1x128xf32, #tpu.memory_space<vmem>> -> memref<1x128xf32, #tpu.memory_space<vmem>>
    %42 = tpu.memref_slice %arg9[%12] : memref<2x!tpu.dma_semaphore, #tpu.memory_space<semaphore_mem>> -> memref<1x!tpu.dma_semaphore, #tpu.memory_space<semaphore_mem>>
    %43 = tpu.memref_squeeze %42 : memref<1x!tpu.dma_semaphore, #tpu.memory_space<semaphore_mem>> -> memref<!tpu.dma_semaphore, #tpu.memory_space<semaphore_mem>>
    tpu.wait_dma2 semaphore(%43 : memref<!tpu.dma_semaphore, #tpu.memory_space<semaphore_mem>>) src(%39 : memref<1x128xf32, #tpu.memory_space<vmem>>) dst(%41 : memref<1x128xf32, #tpu.memory_space<vmem>>)
    %c4_i32 = arith.constant 4 : i32
    %c0_i32_28 = arith.constant 0 : i32
    %c0_i32_29 = arith.constant 0 : i32
    %44 = tpu.memref_slice %arg8[%12, %c0_i32_28, %c0_i32_29] : memref<2x8x128xf32, #tpu.memory_space<vmem>> -> memref<1x1x128xf32, #tpu.memory_space<vmem>>
    %45 = tpu.memref_squeeze %44 : memref<1x1x128xf32, #tpu.memory_space<vmem>> -> memref<1x128xf32, #tpu.memory_space<vmem>>
    %c0_i32_30 = arith.constant 0 : i32
    %c0_i32_31 = arith.constant 0 : i32
    %46 = tpu.memref_slice %arg8[%12, %c0_i32_30, %c0_i32_31] : memref<2x8x128xf32, #tpu.memory_space<vmem>> -> memref<1x1x128xf32, #tpu.memory_space<vmem>>
    %47 = tpu.memref_squeeze %46 : memref<1x1x128xf32, #tpu.memory_space<vmem>> -> memref<1x128xf32, #tpu.memory_space<vmem>>
    %48 = tpu.memref_slice %arg9[%12] : memref<2x!tpu.dma_semaphore, #tpu.memory_space<semaphore_mem>> -> memref<1x!tpu.dma_semaphore, #tpu.memory_space<semaphore_mem>>
    %49 = tpu.memref_squeeze %48 : memref<1x!tpu.dma_semaphore, #tpu.memory_space<semaphore_mem>> -> memref<!tpu.dma_semaphore, #tpu.memory_space<semaphore_mem>>
    tpu.wait_dma2 semaphore(%49 : memref<!tpu.dma_semaphore, #tpu.memory_space<semaphore_mem>>) src(%45 : memref<1x128xf32, #tpu.memory_space<vmem>>) dst(%47 : memref<1x128xf32, #tpu.memory_space<vmem>>)
    %c5_i32 = arith.constant 5 : i32
    %c0_i32_32 = arith.constant 0 : i32
    %c0_i32_33 = arith.constant 0 : i32
    %50 = tpu.memref_slice %arg8[%12, %c0_i32_32, %c0_i32_33] : memref<2x8x128xf32, #tpu.memory_space<vmem>> -> memref<1x1x128xf32, #tpu.memory_space<vmem>>
    %51 = tpu.memref_squeeze %50 : memref<1x1x128xf32, #tpu.memory_space<vmem>> -> memref<1x128xf32, #tpu.memory_space<vmem>>
    %c0_i32_34 = arith.constant 0 : i32
    %c0_i32_35 = arith.constant 0 : i32
    %52 = tpu.memref_slice %arg8[%12, %c0_i32_34, %c0_i32_35] : memref<2x8x128xf32, #tpu.memory_space<vmem>> -> memref<1x1x128xf32, #tpu.memory_space<vmem>>
    %53 = tpu.memref_squeeze %52 : memref<1x1x128xf32, #tpu.memory_space<vmem>> -> memref<1x128xf32, #tpu.memory_space<vmem>>
    %54 = tpu.memref_slice %arg9[%12] : memref<2x!tpu.dma_semaphore, #tpu.memory_space<semaphore_mem>> -> memref<1x!tpu.dma_semaphore, #tpu.memory_space<semaphore_mem>>
    %55 = tpu.memref_squeeze %54 : memref<1x!tpu.dma_semaphore, #tpu.memory_space<semaphore_mem>> -> memref<!tpu.dma_semaphore, #tpu.memory_space<semaphore_mem>>
    tpu.wait_dma2 semaphore(%55 : memref<!tpu.dma_semaphore, #tpu.memory_space<semaphore_mem>>) src(%51 : memref<1x128xf32, #tpu.memory_space<vmem>>) dst(%53 : memref<1x128xf32, #tpu.memory_space<vmem>>)
    %c6_i32 = arith.constant 6 : i32
    %c0_i32_36 = arith.constant 0 : i32
    %c0_i32_37 = arith.constant 0 : i32
    %56 = tpu.memref_slice %arg8[%12, %c0_i32_36, %c0_i32_37] : memref<2x8x128xf32, #tpu.memory_space<vmem>> -> memref<1x1x128xf32, #tpu.memory_space<vmem>>
    %57 = tpu.memref_squeeze %56 : memref<1x1x128xf32, #tpu.memory_space<vmem>> -> memref<1x128xf32, #tpu.memory_space<vmem>>
    %c0_i32_38 = arith.constant 0 : i32
    %c0_i32_39 = arith.constant 0 : i32
    %58 = tpu.memref_slice %arg8[%12, %c0_i32_38, %c0_i32_39] : memref<2x8x128xf32, #tpu.memory_space<vmem>> -> memref<1x1x128xf32, #tpu.memory_space<vmem>>
    %59 = tpu.memref_squeeze %58 : memref<1x1x128xf32, #tpu.memory_space<vmem>> -> memref<1x128xf32, #tpu.memory_space<vmem>>
    %60 = tpu.memref_slice %arg9[%12] : memref<2x!tpu.dma_semaphore, #tpu.memory_space<semaphore_mem>> -> memref<1x!tpu.dma_semaphore, #tpu.memory_space<semaphore_mem>>
    %61 = tpu.memref_squeeze %60 : memref<1x!tpu.dma_semaphore, #tpu.memory_space<semaphore_mem>> -> memref<!tpu.dma_semaphore, #tpu.memory_space<semaphore_mem>>
    tpu.wait_dma2 semaphore(%61 : memref<!tpu.dma_semaphore, #tpu.memory_space<semaphore_mem>>) src(%57 : memref<1x128xf32, #tpu.memory_space<vmem>>) dst(%59 : memref<1x128xf32, #tpu.memory_space<vmem>>)
    %c7_i32 = arith.constant 7 : i32
    %c0_i32_40 = arith.constant 0 : i32
    %c0_i32_41 = arith.constant 0 : i32
    %62 = tpu.memref_slice %arg8[%12, %c0_i32_40, %c0_i32_41] : memref<2x8x128xf32, #tpu.memory_space<vmem>> -> memref<1x1x128xf32, #tpu.memory_space<vmem>>
    %63 = tpu.memref_squeeze %62 : memref<1x1x128xf32, #tpu.memory_space<vmem>> -> memref<1x128xf32, #tpu.memory_space<vmem>>
    %c0_i32_42 = arith.constant 0 : i32
    %c0_i32_43 = arith.constant 0 : i32
    %64 = tpu.memref_slice %arg8[%12, %c0_i32_42, %c0_i32_43] : memref<2x8x128xf32, #tpu.memory_space<vmem>> -> memref<1x1x128xf32, #tpu.memory_space<vmem>>
    %65 = tpu.memref_squeeze %64 : memref<1x1x128xf32, #tpu.memory_space<vmem>> -> memref<1x128xf32, #tpu.memory_space<vmem>>
    %66 = tpu.memref_slice %arg9[%12] : memref<2x!tpu.dma_semaphore, #tpu.memory_space<semaphore_mem>> -> memref<1x!tpu.dma_semaphore, #tpu.memory_space<semaphore_mem>>
    %67 = tpu.memref_squeeze %66 : memref<1x!tpu.dma_semaphore, #tpu.memory_space<semaphore_mem>> -> memref<!tpu.dma_semaphore, #tpu.memory_space<semaphore_mem>>
    tpu.wait_dma2 semaphore(%67 : memref<!tpu.dma_semaphore, #tpu.memory_space<semaphore_mem>>) src(%63 : memref<1x128xf32, #tpu.memory_space<vmem>>) dst(%65 : memref<1x128xf32, #tpu.memory_space<vmem>>)
    %68 = arith.index_cast %12 : i32 to index
    %c0 = arith.constant 0 : index
    %c0_44 = arith.constant 0 : index
    %69 = vector.load %arg8[%68, %c0, %c0_44] : memref<2x8x128xf32, #tpu.memory_space<vmem>>, vector<1x8x128xf32>
    %70 = vector.shape_cast %69 : vector<1x8x128xf32> to vector<8x128xf32>
    %c0_45 = arith.constant 0 : index
    %c0_46 = arith.constant 0 : index
    %71 = vector.load %arg4[%c0_45, %c0_46] : memref<8x128xf32, #tpu.memory_space<vmem>>, vector<8x128xf32>
    %72 = arith.addf %70, %71 : vector<8x128xf32>
    %cst = arith.constant dense<0.000000e+00> : vector<8xf32>
    %73 = vector.multi_reduction <add>, %72, %cst [1] : vector<8x128xf32> to vector<8xf32>
    %74 = vector.shape_cast %73 : vector<8xf32> to vector<8x1xf32>
    %cst_47 = arith.constant 3.125000e-02 : f32
    %75 = vector.broadcast %cst_47 : f32 to vector<8x1xf32>
    %76 = arith.mulf %74, %75 : vector<8x1xf32>
    %77 = vector.broadcast %76 : vector<8x1xf32> to vector<8x128xf32>
    %78 = arith.subf %72, %77 : vector<8x128xf32>
    %79 = arith.mulf %78, %78 : vector<8x128xf32>
    %80 = tpu.iota {dimensions = array<i32: 1>} : vector<8x128xi32>
    %c32_i32 = arith.constant 32 : i32
    %81 = vector.broadcast %c32_i32 : i32 to vector<8x128xi32>
    %82 = arith.cmpi slt, %80, %81 : vector<8x128xi32>
    %cst_48 = arith.constant 0.000000e+00 : f32
    %83 = vector.broadcast %cst_48 : f32 to vector<8x128xf32>
    %84 = arith.select %82, %79, %83 : vector<8x128xi1>, vector<8x128xf32>
    %cst_49 = arith.constant dense<0.000000e+00> : vector<8xf32>
    %85 = vector.multi_reduction <add>, %84, %cst_49 [1] : vector<8x128xf32> to vector<8xf32>
    %86 = vector.shape_cast %85 : vector<8xf32> to vector<8x1xf32>
    %cst_50 = arith.constant 3.125000e-02 : f32
    %87 = vector.broadcast %cst_50 : f32 to vector<8x1xf32>
    %88 = arith.mulf %86, %87 : vector<8x1xf32>
    %cst_51 = arith.constant 9.99999974E-6 : f32
    %89 = vector.broadcast %cst_51 : f32 to vector<8x1xf32>
    %90 = arith.addf %88, %89 : vector<8x1xf32>
    %91 = math.rsqrt %90 : vector<8x1xf32>
    %92 = vector.broadcast %91 : vector<8x1xf32> to vector<8x128xf32>
    %93 = arith.mulf %78, %92 : vector<8x128xf32>
    %c0_52 = arith.constant 0 : index
    %c0_53 = arith.constant 0 : index
    %94 = vector.load %arg5[%c0_52, %c0_53] : memref<1x128xf32, #tpu.memory_space<vmem>>, vector<1x128xf32>
    %95 = vector.broadcast %94 : vector<1x128xf32> to vector<8x128xf32>
    %96 = arith.mulf %93, %95 : vector<8x128xf32>
    %c0_54 = arith.constant 0 : index
    %c0_55 = arith.constant 0 : index
    %97 = vector.load %arg6[%c0_54, %c0_55] : memref<1x128xf32, #tpu.memory_space<vmem>>, vector<1x128xf32>
    %98 = vector.broadcast %97 : vector<1x128xf32> to vector<8x128xf32>
    %99 = arith.addf %96, %98 : vector<8x128xf32>
    %c0_56 = arith.constant 0 : index
    %c0_57 = arith.constant 0 : index
    %100 = vector.load %arg7[%c0_56, %c0_57] : memref<8x128xf32, #tpu.memory_space<vmem>>, vector<8x128xf32>
    tpu.vector_store %arg7[%c0_56, %c0_57], %99 {strides = array<i32>} : memref<8x128xf32, #tpu.memory_space<vmem>>, vector<8x128xf32>,
    return
  }
  func.func @transform_0(%arg0: i32, %arg1: i32, %arg2: memref<16xi32, #tpu.memory_space<smem>>) -> (i32, i32) {
    %c0_i32 = arith.constant 0 : i32
    %c0_i32_0 = arith.constant 0 : i32
    %c0_i32_1 = arith.constant 0 : i32
    return %c0_i32, %c0_i32_0 : i32, i32
  }
  func.func @transform_1(%arg0: i32, %arg1: i32, %arg2: memref<16xi32, #tpu.memory_space<smem>>) -> (i32, i32) {
    %c0_i32 = arith.constant 0 : i32
    %c0_i32_0 = arith.constant 0 : i32
    return %arg0, %c0_i32 : i32, i32
  }
  func.func @transform_2(%arg0: i32, %arg1: i32, %arg2: memref<16xi32, #tpu.memory_space<smem>>) -> (i32, i32) {
    %c0_i32 = arith.constant 0 : i32
    %c0_i32_0 = arith.constant 0 : i32
    %c0_i32_1 = arith.constant 0 : i32
    return %c0_i32, %c0_i32_0 : i32, i32
  }
  func.func @transform_3(%arg0: i32, %arg1: i32, %arg2: memref<16xi32, #tpu.memory_space<smem>>) -> (i32, i32) {
    %c0_i32 = arith.constant 0 : i32
    %c0_i32_0 = arith.constant 0 : i32
    %c0_i32_1 = arith.constant 0 : i32
    return %c0_i32, %c0_i32_0 : i32, i32
  }
  func.func @transform_4(%arg0: i32, %arg1: i32, %arg2: memref<16xi32, #tpu.memory_space<smem>>) -> (i32, i32) {
    %c1_i32 = arith.constant 1 : i32
    %0 = arith.muli %arg1, %c1_i32 : i32
    %1 = arith.addi %0, %arg0 : i32
    %c0_i32 = arith.constant 0 : i32
    %c0_i32_0 = arith.constant 0 : i32
    return %1, %c0_i32 : i32, i32
  }
}

</mosaic_0001>

<bundles_post_ra>
// kernel: tpu_custom_call.1
= control target key start
LH: loop header
LB: loop body
LE: loop exit
PB: predicated region body
PF: predicated region fallthrough
CT: control target
= control target key end

     0   :  { %s1438_s21 = smov [#allocation5]   ;;  %s1662_s0 = inlined_call_operand.hbm [shape: s32[16], index: 0, kind: input, shape index: {}]   ;;  %s1663_s1 = inlined_call_operand.hbm [shape: f32[32,128], index: 1, kind: input, shape index: {}]   ;;  %s1664_s2 = inlined_call_operand.hbm [shape: f32[16,128], index: 2, kind: input, shape index: {}]   ;;  %s1665_s3 = inlined_call_operand.vmem [shape: f32[1,128], index: 3, kind: input, shape index: {}]   ;;  %s1666_s4 = inlined_call_operand.vmem [shape: f32[1,128], index: 4, kind: input, shape index: {}]   ;;  %s1667_s5 = inlined_call_operand.hbm [shape: f32[16,128], index: 5, kind: output, shape index: {}]  }
   0x1   :  { %s11_s20 = sshll.u32 %s1662_s0, 4  ;;  %s12_s20 = int_to_ptr.hbm [resolvable:$true] %s11_s20 }
   0x2   :  { %14 = dma.hbm_to_smem %s12_s20, 16, %s1438_s21, [#allocation4] }
   0x3   :  { %1398 = dma.done.wait [#allocation4], 16 }
   0x4   :  { %1399 = vsyncadd [#allocation4], 4294967280 }
   0x5   :  { %17 = sfence }
   0x6   :  { %18 = vsyncpa [#allocation7], 0 }
   0x7   :  { %19 = vsyncpa [#allocation10], 0 }
   0x8   :  { %20 = vsyncpa [#allocation8], 0 }
   0x9   :  { %22 = vsyncpa [#allocation8 + $0x1], 0  ;;  %s1476_s22 = smov 0   ;;  %s1478_s23 = smov 0  }
   0xa   :  { %s1480_s24 = smov 0   ;;  %s1482_s25 = smov 0  }
   0xb   :  { %s1484_s26 = smov 0   ;;  %s1486_s0 = smov 0  }
   0xc LB: > { %s1154_s27 = sadd.s32 4294967295, %s1436_s0   ;;  %s1155_s28 = sadd.s32 4294967294, %s1436_s0   ;;  %s1436_s0 = sphi %s1486_s0, %s28_s0   ;;  %s1432_s26 = sphi %s1484_s26, %s1676_s26   ;;  %s1428_s25 = sphi %s1482_s25, %s1675_s25   ;;  %s1424_s24 = sphi %s1480_s24, %s1674_s24   ;;  %s1420_s23 = sphi %s1478_s23, %s1673_s23   ;;  %s1416_s22 = sphi %s1476_s22, %s1672_s22  }
   0xd   : > { %s37_s29 = sadd.s32 1, %s1432_s26  ;;  %s138_s30 = sadd.s32 1, %s1424_s24 }
   0xe   : > { %p38_p0 = scmp.ge.s32.totalorder %s37_s29, 2  ;;  %p148_p1 = scmp.ne.s32.totalorder %s1424_s24, %s1420_s23 }
   0xf   : > { %p149_p2 = scmp.eq.s32.totalorder %s1154_s27, 1  ;;  %p154_p3 = scmp.ne.s32.totalorder %s1420_s23, %s1416_s22 }
  0x10   : > { %s1678_s29 = smov (%p38_p0, %s37_s29), 0  ;;  %p155_p5 = scmp.eq.s32.totalorder %s1155_s28, 1 }
  0x11   : > { %p1516_p4 = por %p149_p2, %p148_p1  ;;  %s135_s7 = ssub.s32 %s1432_s26, %s1678_s29 }
  0x12   : > { %p1156_p6 = scmp.ge.s32.totalorder %s1436_s0, 1  ;;  %p136_p7 = scmp.eq.s32.totalorder %s135_s7, 0 }
  0x13   : > { %p1523_p8 = por %p155_p5, %p154_p3  ;;  %p162_p9 = scmp.lt.s32.totalorder %s1436_s0, 3 }
  0x14   : > { %s1529_s9 = scalar_select %p136_p7, %s1424_s24, %s138_s30  }
  0x15   : > { %p1531_p10 = pnand %p1156_p6, %p162_p9  ;;  %p1535_p11 = scmp.eq.s32.totalorder %s1154_s27, 0 }
  0x16   : > { %s173_s14 = sshll.u32 %s1663_s1, 4  ;;  %s1439_s15 = smov [#allocation6]   ;;  %s174_s14 = int_to_ptr.hbm [resolvable:$true] %s173_s14 }
  0x17   : > { %p1201_p12 = pneg %p1531_p10  ;;  %s175_s16 = sshll.u32 %s1439_s15, 4  ;;  %s176_s16 = int_to_ptr.vmem [resolvable:$true] %s175_s16 }
  0x18   : > { %s190_s19 = sshll.u32 %s1664_s2, 4  ;;  %s1440_s20 = smov 128   ;;  %s191_s19 = int_to_ptr.hbm [resolvable:$true] %s190_s19 }
  0x19   : > { %p1202_p13 = pnand %p1535_p11, %p1201_p12  ;;  %s1441_s21 = smov 8  }
  0x1a   : > { %s1442_s27 = smov [#allocation9]   ;;  %211 = sbr.rel (%p1531_p10) target bundleno = 479 (0x1df), region = 36 }
  0x1b   : > { %1204 = dma.hbm_to_vmem [thread:$0]  (!%p1202_p13), %s174_s14, 512, %s176_s16, [#allocation7], %s1440_s20, %s1440_s20, %s1441_s21  }
  0x1c   : > { %s192_s28 = sshll.u32 %s1442_s27, 4  ;;  %s193_s28 = int_to_ptr.vmem [resolvable:$true] %s192_s28 }
  0x1d   : > { %1207 = dma.hbm_to_vmem [thread:$0]  (!%p1202_p13), %s191_s19, 128, %s193_s28, [#allocation10]  }
  0x1f   : > { %1401 = dma.done.wait (%p1535_p11), [#allocation7], 512  }
  0x20   : > { %1403 = vsyncadd (%p1535_p11), [#allocation7], 4294966784 }
  0x21   : > { %1405 = dma.done.wait (%p1535_p11), [#allocation10], 128  }
  0x22   : > { %1407 = vsyncadd (%p1535_p11), [#allocation10], 4294967168  ;;  %s235_s30 = sand.u32 1, %s1420_s23   ;;  %s1561_s7 = sshll.u32 %s1428_s25, 3 }
  0x23   : > { %s1565_s10 = sshll.u32 %s235_s30, 3  ;;  %p242_p0 = scmp.lt.s32.totalorder %s1428_s25, 0 }
  0x24   : > { %s243_s12 = ssub.s32 0, %s1428_s25  ;;  %s237_s16 = scalar_lea.vmem [#allocation11], %s1565_s10 }
  0x25   : > { %s1164_s13 = smin.u32 %s1428_s25, %s243_s12  ;;  %p1167_p2 = scmp.ne.s32.totalorder %s1428_s25, 0 }
  0x26   : > { %s245_s14 = sand.u32 1, %s1164_s13   ;;  %s258_s17 = sld [smem:[#allocation5 + %s1561_s7]] (!%p1167_p2) }
  0x27   : > { %s246_s15 = ssub.s32 0, %s245_s14  ;;  %257 = sbr.rel (%p1167_p2) target bundleno = 118 (0x76), region = 48 }
  0x28   : > { %s1680_s15 = smov (!%p242_p0, %s246_s15), %s245_s14 }
  0x29   : > { %p1166_p1 = scmp.lt.s32.totalorder %s1680_s15, 0  ;;  %s252_s11 = sadd.s32 2, %s1680_s15 }
  0x2b   : > { %s1682_s11 = smov (!%p1166_p1, %s252_s11), %s1680_s15 }
  0x2c   : > { %s259_s18 = scalar_lea.vmem [#allocation6], %s258_s17 }
  0x2d   : > { %v274_v0 = vld [vmem:[%s259_s18] sm:$0x1] }
  0x2e   : > { %275 = vst [vmem:[#allocation2] sm:$0x1] %v274_v0 }
  0x2f   : > { %293 = vsyncadd [#allocation3], 16  ;;  %s294_s19 = sadd.s32 1, %s1561_s7 }
  0x30   : > { %s295_s20 = sld [smem:[#allocation5 + %s294_s19]] }
  0x36   : > { %s296_s21 = scalar_lea.vmem [#allocation6], %s295_s20 }
  0x37   : > { %v312_v1 = vld [vmem:[%s296_s21] sm:$0x1] }
  0x38   : > { %313 = vst [vmem:[#allocation2 + $0x1] sm:$0x1] %v312_v1 }
  0x39   : > { %331 = vsyncadd [#allocation3], 16  ;;  %s332_s27 = sadd.s32 2, %s1561_s7 }
  0x3a   : > { %s333_s28 = sld [smem:[#allocation5 + %s332_s27]] }
  0x40   : > { %s334_s12 = scalar_lea.vmem [#allocation6], %s333_s28 }
  0x41   : > { %v350_v2 = vld [vmem:[%s334_s12] sm:$0x1] }
  0x42   : > { %351 = vst [vmem:[#allocation2 + $0x2] sm:$0x1] %v350_v2 }
  0x43   : > { %369 = vsyncadd [#allocation3], 16  ;;  %s370_s13 = sadd.s32 3, %s1561_s7 }
  0x44   : > { %s371_s14 = sld [smem:[#allocation5 + %s370_s13]] }
  0x4a   : > { %s372_s15 = scalar_lea.vmem [#allocation6], %s371_s14 }
  0x4b   : > { %v388_v3 = vld [vmem:[%s372_s15] sm:$0x1] }
  0x4c   : > { %389 = vst [vmem:[#allocation2 + $0x3] sm:$0x1] %v388_v3 }
  0x4d   : > { %407 = vsyncadd [#allocation3], 16  ;;  %s408_s17 = sadd.s32 4, %s1561_s7 }
  0x4e   : > { %s409_s18 = sld [smem:[#allocation5 + %s408_s17]] }
  0x54   : > { %s410_s19 = scalar_lea.vmem [#allocation6], %s409_s18 }
  0x55   : > { %v426_v4 = vld [vmem:[%s410_s19] sm:$0x1] }
  0x56   : > { %427 = vst [vmem:[#allocation2 + $0x4] sm:$0x1] %v426_v4 }
  0x57   : > { %445 = vsyncadd [#allocation3], 16  ;;  %s446_s20 = sadd.s32 5, %s1561_s7 }
  0x58   : > { %s447_s21 = sld [smem:[#allocation5 + %s446_s20]] }
  0x5e   : > { %s448_s27 = scalar_lea.vmem [#allocation6], %s447_s21 }
  0x5f   : > { %v464_v5 = vld [vmem:[%s448_s27] sm:$0x1] }
  0x60   : > { %465 = vst [vmem:[#allocation2 + $0x5] sm:$0x1] %v464_v5 }
  0x61   : > { %483 = vsyncadd [#allocation3], 16  ;;  %s484_s28 = sadd.s32 6, %s1561_s7 }
  0x62   : > { %s485_s12 = sld [smem:[#allocation5 + %s484_s28]] }
  0x68   : > { %s486_s13 = scalar_lea.vmem [#allocation6], %s485_s12 }
  0x69   : > { %v502_v6 = vld [vmem:[%s486_s13] sm:$0x1] }
  0x6a   : > { %503 = vst [vmem:[#allocation2 + $0x6] sm:$0x1] %v502_v6 }
  0x6b   : > { %521 = vsyncadd [#allocation3], 16  ;;  %s522_s14 = sadd.s32 7, %s1561_s7 }
  0x6c   : > { %s523_s15 = sld [smem:[#allocation5 + %s522_s14]] }
  0x72   : > { %s524_s17 = scalar_lea.vmem [#allocation6], %s523_s15 }
  0x73   : > { %v540_v7 = vld [vmem:[%s524_s17] sm:$0x1] }
  0x74   : > { %541 = vst [vmem:[#allocation2 + $0x7] sm:$0x1] %v540_v7 }
  0x75   : > { %559 = vsyncadd [#allocation3], 16 }
  0x76 PF: > { %s560_s18 = sadd.s32 1, %s1428_s25 }
  0x77   : > { %p1168_p3 = scmp.ge.s32.totalorder %s560_s18, 2 }
  0x78   : > { %s565_s19 = sadd.s32 (!%p1168_p3), 8, %s1561_s7  ;;  %s566_s20 = ssub.s32 (!%p1168_p3), 1, %s1682_s11 }
  0x79   : > { %564 = sbr.rel (%p1168_p3) target bundleno = 201 (0xc9), region = 292  ;;  %s567_s21 = sld [smem:[#allocation5 + %s565_s19]] (!%p1168_p3) }
  0x7a   : > { %s1169_s27 = sshll.u32 (!%p1168_p3), %s566_s20, 3  ;;  %s1588_s13 = scalar_lea.sflag (!%p1168_p3), [#allocation3], %s566_s20 }
  0x7b   : > { %s1585_s12 = scalar_lea.vmem (!%p1168_p3), [#allocation2], %s1169_s27 }
  0x7f   : > { %s568_s28 = scalar_lea.vmem [#allocation6], %s567_s21 }
  0x80   : > { %v586_v8 = vld [vmem:[%s568_s28] sm:$0x1] }
  0x81   : > { %587 = vst [vmem:[%s1585_s12] sm:$0x1] %v586_v8 }
  0x82   : > { %605 = vsyncadd %s1588_s13, 16  ;;  %s606_s25 = sadd.s32 9, %s1561_s7 }
  0x83   : > { %s607_s14 = sld [smem:[#allocation5 + %s606_s25]] }
  0x89   : > { %s608_s15 = scalar_lea.vmem [#allocation6], %s607_s14 }
  0x8a   : > { %v625_v9 = vld [vmem:[%s608_s15] sm:$0x1] }
  0x8b   : > { %1171 = vst [vmem:[%s1585_s12 + $0x1] sm:$0x1] %v625_v9 }
  0x8c   : > { %644 = vsyncadd %s1588_s13, 16  ;;  %s645_s17 = sadd.s32 10, %s1561_s7 }
  0x8d   : > { %s646_s18 = sld [smem:[#allocation5 + %s645_s17]] }
  0x93   : > { %s647_s19 = scalar_lea.vmem [#allocation6], %s646_s18 }
  0x94   : > { %v664_v10 = vld [vmem:[%s647_s19] sm:$0x1] }
  0x95   : > { %1173 = vst [vmem:[%s1585_s12 + $0x2] sm:$0x1] %v664_v10 }
  0x96   : > { %683 = vsyncadd %s1588_s13, 16  ;;  %s684_s20 = sadd.s32 11, %s1561_s7 }
  0x97   : > { %s685_s21 = sld [smem:[#allocation5 + %s684_s20]] }
  0x9d   : > { %s686_s27 = scalar_lea.vmem [#allocation6], %s685_s21 }
  0x9e   : > { %v703_v11 = vld [vmem:[%s686_s27] sm:$0x1] }
  0x9f   : > { %1175 = vst [vmem:[%s1585_s12 + $0x3] sm:$0x1] %v703_v11 }
  0xa0   : > { %722 = vsyncadd %s1588_s13, 16  ;;  %s723_s28 = sadd.s32 12, %s1561_s7 }
  0xa1   : > { %s724_s25 = sld [smem:[#allocation5 + %s723_s28]] }
  0xa7   : > { %s725_s14 = scalar_lea.vmem [#allocation6], %s724_s25 }
  0xa8   : > { %v742_v12 = vld [vmem:[%s725_s14] sm:$0x1] }
  0xa9   : > { %1177 = vst [vmem:[%s1585_s12 + $0x4] sm:$0x1] %v742_v12 }
  0xaa   : > { %761 = vsyncadd %s1588_s13, 16  ;;  %s762_s15 = sadd.s32 13, %s1561_s7 }
  0xab   : > { %s763_s17 = sld [smem:[#allocation5 + %s762_s15]] }
  0xb1   : > { %s764_s18 = scalar_lea.vmem [#allocation6], %s763_s17 }
  0xb2   : > { %v781_v13 = vld [vmem:[%s764_s18] sm:$0x1] }
  0xb3   : > { %1179 = vst [vmem:[%s1585_s12 + $0x5] sm:$0x1] %v781_v13 }
  0xb4   : > { %800 = vsyncadd %s1588_s13, 16  ;;  %s801_s19 = sadd.s32 14, %s1561_s7 }
  0xb5   : > { %s802_s20 = sld [smem:[#allocation5 + %s801_s19]] }
  0xbb   : > { %s803_s21 = scalar_lea.vmem [#allocation6], %s802_s20 }
  0xbc   : > { %v820_v14 = vld [vmem:[%s803_s21] sm:$0x1] }
  0xbd   : > { %1181 = vst [vmem:[%s1585_s12 + $0x6] sm:$0x1] %v820_v14 }
  0xbe   : > { %839 = vsyncadd %s1588_s13, 16  ;;  %s840_s27 = sadd.s32 15, %s1561_s7 }
  0xbf   : > { %s841_s28 = sld [smem:[#allocation5 + %s840_s27]] }
  0xc5   : > { %s842_s25 = scalar_lea.vmem [#allocation6], %s841_s28 }
  0xc6   : > { %v859_v15 = vld [vmem:[%s842_s25] sm:$0x1] }
  0xc7   : > { %1183 = vst [vmem:[%s1585_s12 + $0x7] sm:$0x1] %v859_v15 }
  0xc8   : > { %878 = vsyncadd %s1588_s13, 16 }
  0xc9 PF: > { %s879_s14 = scalar_lea.sflag [#allocation3], %s1682_s11 }
  0xca   : > { %1408 = dma.done.wait %s879_s14, 128 }
  0xcb   : > { %1409 = vsyncadd %s879_s14, 4294967168  ;;  %s1184_s15 = sshll.u32 %s1682_s11, 3  ;;  %v900_v17 = vld [vmem:[#allocation9] sm:$0xff]  ;;  %v907_v19 = vlaneseq  ;;  %v1270_v35 = vld [vmem:[%s1665_s3] ss:$0 sm:$0xff]  ;;  %s949_s19 = scalar_lea.hbm %s1667_s5, %s1561_s7 }
  0xcc   : > { %s898_s17 = scalar_lea.vmem [#allocation2], %s1184_s15  ;;  %v1271_v38 = vld [vmem:[%s1666_s4] ss:$0 sm:$0xff]  ;;  %s951_s27 = sshll.u32 %s237_s16, 4  ;;  %s952_s27 = int_to_ptr.vmem [resolvable:$true] %s951_s27 }
  0xcd   : > { %v908_v21 = vand.u32 127, %v907_v19  ;;  %s953_s28 = sshll.u32 %s949_s19, 4  ;;  %s938_s25 = scalar_lea.sflag [#allocation8], %s235_s30  ;;  %s954_s28 = int_to_ptr.hbm [resolvable:$true] %s953_s28 }
  0xce   : > { %v899_v16 = vld [vmem:[%s898_s17] sm:$0xff]  ;;  %s1360_s14 = sshra.s32 %s954_s28, 4  ;;  %s1366_s11 = scalar_lea.hbm %s1667_s5, 16  ;;  %s1361_s14 = int_to_ptr.hbm [resolvable:$true] %s1360_s14 }
  0xcf   : > { %v901_v18 = vadd.f32 %v900_v17, %v899_v16  ;;  %vm909_vm0 = vcmp.lt.s32.totalorder %v908_v21, 32  ;;  %s1362_s7 = scalar_lea.hbm %s1361_s14, 8  ;;  %p1367_p9 = scmp.lt.s32.totalorder %s1361_s14, %s1667_s5 }
  0xd0   : > { %p1363_p5 = scmp.ne.s32.totalorder %s1361_s14, %s1362_s7  ;;  %p1368_p10 = scmp.lt.s32.totalorder %s1366_s11, %s1362_s7 }
  0xd1   : > { %902 = vadd.xlane.f32.xlu0 %v901_v18 }
  0xd2   : > { %p1364_p6 = pnand %p1363_p5, %p1516_p4  ;;  %p1369_p11 = por %p1368_p10, %p1367_p9 }
  0xd4   : > { %p1365_p7 = pneg %p1364_p6 }
  0xd6   : > { %p1370_p12 = pnand %p1369_p11, %p1365_p7 }
 0x144   : > { %v903_v20 = vpop.xlane.xlu0 %902 }
 0x145   : > { %v904_v22 = vmul.f32 0.03125, %v903_v20 }
 0x147   : > { %v905_v23 = vsub.f32 %v901_v18, %v904_v22 }
 0x149   : > { %v906_v24 = vmul.f32 %v905_v23, %v905_v23 }
 0x14b   : > { %v910_v25 = vsel %vm909_vm0, %v906_v24, 0.0 }
 0x14c   : > { %911 = vadd.xlane.f32.xlu0 %v910_v25 }
 0x1bf   : > { %v912_v26 = vpop.xlane.xlu0 %911 }
 0x1c0   : > { %v913_v27 = vmul.f32 0.03125, %v912_v26 }
 0x1c2   : > { %v914_v28 = vadd.f32 1e-05, %v913_v27 }
 0x1c4   : > { %1272 = vrsqrt.f32 %v914_v28  ;;  %vm921_vm2 = vweird.f32 %v914_v28 }
 0x1ca   : > { %v1273_v29 = vpop.eup %1272 }
 0x1cb   : > { %v916_v30 = vmul.f32 %v1273_v29, %v914_v28  ;;  %vm922_vm1 = vweird.f32 %v1273_v29 }
 0x1cc   : > { %vm923_vm3 = vmor %vm921_vm2, %vm922_vm1 }
 0x1cd   : > { %v917_v31 = vmul.f32 %v1273_v29, %v916_v30 }
 0x1cf   : > { %v918_v32 = vmul.f32 0.5, %v917_v31 }
 0x1d1   : > { %v919_v33 = vsub.f32 1.5, %v918_v32 }
 0x1d3   : > { %v920_v34 = vmul.f32 %v1273_v29, %v919_v33 }
 0x1d5   : > { %v924_v36 = vsel %vm923_vm3, %v1273_v29, %v920_v34 }
 0x1d6   : > { %v925_v37 = vmul.f32 %v924_v36, %v905_v23 }
 0x1d8   : > { %v930_v39 = vmul.f32 %v1270_v35, %v925_v37 }
 0x1da   : > { %v935_v40 = vadd.f32 %v1271_v38, %v930_v39 }
 0x1dc   : > { %936 = vst [vmem:[%s237_s16] sm:$0xff] %v935_v40 }
 0x1dd   : > { %1373 = shalt.err (!%p1370_p12)
}
 0x1de   : > { %1199 = dma.vmem_to_hbm [thread:$0]  (%p1516_p4), %s952_s27, 128, %s954_s28, %s938_s25  }
 0x1df PF: > { %p1216_p13 = scmp.ge.s32.totalorder %s1436_s0, 2  ;;  %s965_s30 = sand.u32 1, %s1416_s22  }
 0x1e0   : > { %s966_s10 = scalar_lea.sflag [#allocation8], %s965_s30 }
 0x1e1   : > { %p1209_p0 = pnand %p1216_p13, %p1523_p8 }
 0x1e3   : > { %p1210_p1 = pneg %p1209_p0 }
 0x1e5   : > { %1411 = dma.done.wait (%p1210_p1), %s966_s10, 128  }
 0x1e6   : > { %1413 = vsyncadd (%p1210_p1), %s966_s10, 4294967168  ;;  %s28_s0 = sadd.s32 1, %s1436_s0   ;;  %s1672_s22 = smov %s1420_s23 }
 0x1e7   : > { %p25_p2 = scmp.ge.s32.totalorder %s28_s0, 4   ;;  %s1673_s23 = smov %s1424_s24 }
 0x1e8   : > { %s1674_s24 = smov %s1529_s9  ;;  %s1675_s25 = smov %s1432_s26 }
 0x1e9   : > { %s1676_s26 = smov %s1678_s29  ;;  %27 = sbr.rel (!%p25_p2) target bundleno = 12 (0xc), region = 665 }
 0x1ee   :  { %972 = vsyncpa [#allocation7], 1 }
 0x1ef   :  { %974 = vsyncpa [#allocation7 + $0x1], 1 }
 0x1f0   :  { %975 = vsyncpa [#allocation10], 1 }
 0x1f1   :  { %976 = vsyncpa [#allocation8], 1 }
 0x1f2   :  { %978 = vsyncpa [#allocation8 + $0x1], 1 }
 0x1f3   :  { %979 = vsyncmov [#allocation3] }
 0x1f6   :  { %s980_s6 = vpop.sfrf %979 }
 0x1f7   :  { %p1189_p4 = scmp.ne.s32.totalorder %s980_s6, 0 }
 0x1f9   :  { %984 = shalt.err (%p1189_p4)  }
 0x1fa   :  { %986 = vsyncmov [#allocation3 + $0x1] }
 0x1fd   :  { %s987_s8 = vpop.sfrf %986 }
 0x1fe   :  { %p1190_p8 = scmp.ne.s32.totalorder %s987_s8, 0 }
 0x200   :  { %991 = shalt.err (%p1190_p8)  }

</bundles_post_ra>
